<compile_context>
chip_gen: v6e
topology: v6e:2x2x1
jax: 0.10.0
libtpu: 0.0.40
codegen_flags: <defaults>
</compile_context>

<pallas_src>
import jax
import jax.numpy as jnp
from jax.experimental import pallas as pl
from jax.experimental.pallas import tpu as pltpu


def _round_up(v, m):
    return (v + m - 1) // m * m


def _cdiv(a, b):
    return -(-a // b)


def _mlp_kernel(x_ref, w1_ref, b1_ref, w2_ref, b2_ref, w3_ref, b3_ref, o_ref):
    # fc1 + ReLU  (dropout1 is identity at inference); x cast f32->bf16 in-kernel.
    x = x_ref[...].astype(jnp.bfloat16)
    h1 = jnp.dot(x, w1_ref[...], preferred_element_type=jnp.float32)
    h1 = jnp.maximum(h1 + b1_ref[...], 0.0)
    # fc2 + ReLU  (dropout2 is identity at inference)
    h2 = jnp.dot(h1.astype(jnp.bfloat16), w2_ref[...],
                 preferred_element_type=jnp.float32)
    h2 = jnp.maximum(h2 + b2_ref[...], 0.0)
    # output layer (true num_classes width)
    out = jnp.dot(h2.astype(jnp.bfloat16), w3_ref[...],
                  preferred_element_type=jnp.float32)
    o_ref[...] = (out + b3_ref[...]).astype(o_ref.dtype)


def prepare_params(w1, b1, w2, b2, w3, b3):
    """One-time (model-load) pad + cast of the weights/biases.

    Hidden dims padded to multiples of 128 (lane-dense intermediates); the
    input-feature and class dims stay at their natural widths. Weights bf16
    for the MXU, biases f32.
    """
    K, H1 = w1.shape
    H2 = w2.shape[1]
    C = w3.shape[1]
    H1p, H2p = _round_up(H1, 128), _round_up(H2, 128)
    bf16 = jnp.bfloat16
    f32 = jnp.float32
    w1p = jnp.zeros((K, H1p), bf16).at[:, :H1].set(w1.astype(bf16))
    w2p = jnp.zeros((H1p, H2p), bf16).at[:H1, :H2].set(w2.astype(bf16))
    w3p = jnp.zeros((H2p, C), bf16).at[:H2, :].set(w3.astype(bf16))
    b1p = jnp.zeros((1, H1p), f32).at[:, :H1].set(jnp.asarray(b1, f32).reshape(1, -1))
    b2p = jnp.zeros((1, H2p), f32).at[:, :H2].set(jnp.asarray(b2, f32).reshape(1, -1))
    b3p = jnp.asarray(b3, f32).reshape(1, -1)
    return (w1p, b1p, w2p, b2p, w3p, b3p)


def keypoint_classifier_forward(x, params, *, block_b=2048):
    """x: [B, input_size] f32; params from prepare_params(). Returns [B, num_classes] f32."""
    w1p, b1p, w2p, b2p, w3p, b3p = params
    B, K = x.shape
    H1p = w1p.shape[1]
    H2p = w2p.shape[1]
    C = w3p.shape[1]
    assert w1p.shape[0] == K

    # Balanced batch tiles (<=8 rows of waste per tile via masked partial blocks),
    # and >=2 tiles when B is large enough so both v7x TensorCores get work.
    n_tiles = max(1, _cdiv(B, block_b))
    if n_tiles == 1 and B >= 16:
        n_tiles = 2
    bm = _round_up(_cdiv(B, n_tiles), 8)
    grid = (max(1, _cdiv(B, bm)),)

    out = pl.pallas_call(
        _mlp_kernel,
        out_shape=jax.ShapeDtypeStruct((B, C), jnp.float32),
        grid=grid,
        in_specs=[
            pl.BlockSpec((bm, K), lambda i: (i, 0)),     # x: streamed per batch tile (f32, natural width)
            pl.BlockSpec((K, H1p), lambda i: (0, 0)),    # weights/biases: VMEM-resident across tiles
            pl.BlockSpec((1, H1p), lambda i: (0, 0)),
            pl.BlockSpec((H1p, H2p), lambda i: (0, 0)),
            pl.BlockSpec((1, H2p), lambda i: (0, 0)),
            pl.BlockSpec((H2p, C), lambda i: (0, 0)),
            pl.BlockSpec((1, C), lambda i: (0, 0)),
        ],
        out_specs=pl.BlockSpec((bm, C), lambda i: (i, 0)),  # true-C writeback, no external slice
        compiler_params=pltpu.CompilerParams(
            dimension_semantics=("parallel",),
            vmem_limit_bytes=32 << 20,
        ),
    )(x.astype(jnp.float32), w1p, b1p, w2p, b2p, w3p, b3p)
    return out


def _reference_forward(x, w1, b1, w2, b2, w3, b3):
    h1 = jnp.maximum(x @ w1 + b1.reshape(1, -1), 0.0)
    h2 = jnp.maximum(h1 @ w2 + b2.reshape(1, -1), 0.0)
    return h2 @ w3 + b3.reshape(1, -1)


if __name__ == "__main__":
    # 21 hand keypoints * 2 coords = 42 input features.
    batch = 8
    input_size = 42
    hidden_size = 32
    num_classes = 10

    key = jax.random.PRNGKey(0)
    kx, k1, k2, k3, kb1, kb2, kb3 = jax.random.split(key, 7)

    x = jax.random.normal(kx, (batch, input_size), dtype=jnp.float32)

    # Parameters stored [in, out]; biases [1, out].
    w1 = 0.1 * jax.random.normal(k1, (input_size, hidden_size), dtype=jnp.float32)
    b1 = 0.1 * jax.random.normal(kb1, (1, hidden_size), dtype=jnp.float32)
    w2 = 0.1 * jax.random.normal(k2, (hidden_size, hidden_size), dtype=jnp.float32)
    b2 = 0.1 * jax.random.normal(kb2, (1, hidden_size), dtype=jnp.float32)
    w3 = 0.1 * jax.random.normal(k3, (hidden_size, num_classes), dtype=jnp.float32)
    b3 = 0.1 * jax.random.normal(kb3, (1, num_classes), dtype=jnp.float32)

    # One-time weight preparation (hoisted out of the per-call path).
    params = prepare_params(w1, b1, w2, b2, w3, b3)
    params = jax.block_until_ready(params)

    out = keypoint_classifier_forward(x, params)
    out = jax.block_until_ready(out)

    ref = _reference_forward(x, w1, b1, w2, b2, w3, b3)
    assert out.shape == (batch, num_classes)
    # bf16 MXU operands with f32 accumulation -> relaxed tolerance vs f32 reference.
    assert jnp.allclose(out, ref, atol=3e-2, rtol=3e-2), "Pallas output mismatch vs reference"

    # TODO(synk): training-mode dropout (p=0.3, inverted scaling via pltpu PRNG) not implemented;
    # this kernel reproduces eval/inference semantics only.
    print("KERNEL_OK")
</pallas_src>

<mosaic_0001>
module attributes {stable_mosaic.version = 11 : i64} {
  func.func @_mlp_kernel(%arg0: i32, %arg1: memref<8x42xf32, #tpu.memory_space<vmem>>, %arg2: memref<42x128xbf16, #tpu.memory_space<vmem>>, %arg3: memref<1x128xf32, #tpu.memory_space<vmem>>, %arg4: memref<128x128xbf16, #tpu.memory_space<vmem>>, %arg5: memref<1x128xf32, #tpu.memory_space<vmem>>, %arg6: memref<128x10xbf16, #tpu.memory_space<vmem>>, %arg7: memref<1x10xf32, #tpu.memory_space<vmem>>, %arg8: memref<8x10xf32, #tpu.memory_space<vmem>>) attributes {dimension_semantics = [#tpu.dimension_semantics<parallel>], iteration_bounds = array<i64: 1>, scalar_prefetch = 0 : i64, scratch_operands = 0 : i64, tpu.core_type = #tpu.core_type<tc>, window_params = [{transform_indices = @transform_0, window_bounds = array<i64: 8, 42>}, {pipeline_mode = #tpu.pipeline_mode<synchronous>, transform_indices = @transform_1, window_bounds = array<i64: 42, 128>}, {pipeline_mode = #tpu.pipeline_mode<synchronous>, transform_indices = @transform_2, window_bounds = array<i64: 1, 128>}, {pipeline_mode = #tpu.pipeline_mode<synchronous>, transform_indices = @transform_3, window_bounds = array<i64: 128, 128>}, {pipeline_mode = #tpu.pipeline_mode<synchronous>, transform_indices = @transform_4, window_bounds = array<i64: 1, 128>}, {pipeline_mode = #tpu.pipeline_mode<synchronous>, transform_indices = @transform_5, window_bounds = array<i64: 128, 10>}, {pipeline_mode = #tpu.pipeline_mode<synchronous>, transform_indices = @transform_6, window_bounds = array<i64: 1, 10>}, {transform_indices = @transform_7, window_bounds = array<i64: 8, 10>}]} {
    %c0 = arith.constant 0 : index
    %c0_0 = arith.constant 0 : index
    %0 = vector.load %arg1[%c0, %c0_0] : memref<8x42xf32, #tpu.memory_space<vmem>>, vector<8x42xf32>
    %1 = arith.truncf %0 : vector<8x42xf32> to vector<8x42xbf16>
    %c0_1 = arith.constant 0 : index
    %c0_2 = arith.constant 0 : index
    %2 = vector.load %arg2[%c0_1, %c0_2] : memref<42x128xbf16, #tpu.memory_space<vmem>>, vector<42x128xbf16>
    %cst = arith.constant dense<0.000000e+00> : vector<8x128xf32>
    %3 = tpu.matmul %1, %2, %cst {dimension_numbers = #tpu.dot_dimension_numbers<[1], [0], [0], [1], [0, 0, 1, 1], [], []>} : vector<8x42xbf16>, vector<42x128xbf16>, vector<8x128xf32> -> vector<8x128xf32>
    %c0_3 = arith.constant 0 : index
    %c0_4 = arith.constant 0 : index
    %4 = vector.load %arg3[%c0_3, %c0_4] : memref<1x128xf32, #tpu.memory_space<vmem>>, vector<1x128xf32>
    %5 = vector.broadcast %4 : vector<1x128xf32> to vector<8x128xf32>
    %6 = arith.addf %3, %5 : vector<8x128xf32>
    %cst_5 = arith.constant 0.000000e+00 : f32
    %7 = vector.broadcast %cst_5 : f32 to vector<8x128xf32>
    %8 = arith.maximumf %6, %7 : vector<8x128xf32>
    %9 = arith.truncf %8 : vector<8x128xf32> to vector<8x128xbf16>
    %c0_6 = arith.constant 0 : index
    %c0_7 = arith.constant 0 : index
    %10 = vector.load %arg4[%c0_6, %c0_7] : memref<128x128xbf16, #tpu.memory_space<vmem>>, vector<128x128xbf16>
    %cst_8 = arith.constant dense<0.000000e+00> : vector<8x128xf32>
    %11 = tpu.matmul %9, %10, %cst_8 {dimension_numbers = #tpu.dot_dimension_numbers<[1], [0], [0], [1], [0, 0, 1, 1], [], []>} : vector<8x128xbf16>, vector<128x128xbf16>, vector<8x128xf32> -> vector<8x128xf32>
    %c0_9 = arith.constant 0 : index
    %c0_10 = arith.constant 0 : index
    %12 = vector.load %arg5[%c0_9, %c0_10] : memref<1x128xf32, #tpu.memory_space<vmem>>, vector<1x128xf32>
    %13 = vector.broadcast %12 : vector<1x128xf32> to vector<8x128xf32>
    %14 = arith.addf %11, %13 : vector<8x128xf32>
    %cst_11 = arith.constant 0.000000e+00 : f32
    %15 = vector.broadcast %cst_11 : f32 to vector<8x128xf32>
    %16 = arith.maximumf %14, %15 : vector<8x128xf32>
    %17 = arith.truncf %16 : vector<8x128xf32> to vector<8x128xbf16>
    %c0_12 = arith.constant 0 : index
    %c0_13 = arith.constant 0 : index
    %18 = vector.load %arg6[%c0_12, %c0_13] : memref<128x10xbf16, #tpu.memory_space<vmem>>, vector<128x10xbf16>
    %cst_14 = arith.constant dense<0.000000e+00> : vector<8x10xf32>
    %19 = tpu.matmul %17, %18, %cst_14 {dimension_numbers = #tpu.dot_dimension_numbers<[1], [0], [0], [1], [0, 0, 1, 1], [], []>} : vector<8x128xbf16>, vector<128x10xbf16>, vector<8x10xf32> -> vector<8x10xf32>
    %c0_15 = arith.constant 0 : index
    %c0_16 = arith.constant 0 : index
    %20 = vector.load %arg7[%c0_15, %c0_16] : memref<1x10xf32, #tpu.memory_space<vmem>>, vector<1x10xf32>
    %21 = vector.broadcast %20 : vector<1x10xf32> to vector<8x10xf32>
    %22 = arith.addf %19, %21 : vector<8x10xf32>
    %c0_17 = arith.constant 0 : index
    %c0_18 = arith.constant 0 : index
    %23 = vector.load %arg8[%c0_17, %c0_18] : memref<8x10xf32, #tpu.memory_space<vmem>>, vector<8x10xf32>
    tpu.vector_store %arg8[%c0_17, %c0_18], %22 {strides = array<i32>} : memref<8x10xf32, #tpu.memory_space<vmem>>, vector<8x10xf32>,
    return
  }
  func.func @transform_0(%arg0: i32) -> (i32, i32) {
    %c0_i32 = arith.constant 0 : i32
    %c0_i32_0 = arith.constant 0 : i32
    return %arg0, %c0_i32 : i32, i32
  }
  func.func @transform_1(%arg0: i32) -> (i32, i32) {
    %c0_i32 = arith.constant 0 : i32
    %c0_i32_0 = arith.constant 0 : i32
    %c0_i32_1 = arith.constant 0 : i32
    return %c0_i32, %c0_i32_0 : i32, i32
  }
  func.func @transform_2(%arg0: i32) -> (i32, i32) {
    %c0_i32 = arith.constant 0 : i32
    %c0_i32_0 = arith.constant 0 : i32
    %c0_i32_1 = arith.constant 0 : i32
    return %c0_i32, %c0_i32_0 : i32, i32
  }
  func.func @transform_3(%arg0: i32) -> (i32, i32) {
    %c0_i32 = arith.constant 0 : i32
    %c0_i32_0 = arith.constant 0 : i32
    %c0_i32_1 = arith.constant 0 : i32
    return %c0_i32, %c0_i32_0 : i32, i32
  }
  func.func @transform_4(%arg0: i32) -> (i32, i32) {
    %c0_i32 = arith.constant 0 : i32
    %c0_i32_0 = arith.constant 0 : i32
    %c0_i32_1 = arith.constant 0 : i32
    return %c0_i32, %c0_i32_0 : i32, i32
  }
  func.func @transform_5(%arg0: i32) -> (i32, i32) {
    %c0_i32 = arith.constant 0 : i32
    %c0_i32_0 = arith.constant 0 : i32
    %c0_i32_1 = arith.constant 0 : i32
    return %c0_i32, %c0_i32_0 : i32, i32
  }
  func.func @transform_6(%arg0: i32) -> (i32, i32) {
    %c0_i32 = arith.constant 0 : i32
    %c0_i32_0 = arith.constant 0 : i32
    %c0_i32_1 = arith.constant 0 : i32
    return %c0_i32, %c0_i32_0 : i32, i32
  }
  func.func @transform_7(%arg0: i32) -> (i32, i32) {
    %c0_i32 = arith.constant 0 : i32
    %c0_i32_0 = arith.constant 0 : i32
    return %arg0, %c0_i32 : i32, i32
  }
}

</mosaic_0001>

<bundles_post_ra>
// kernel: tpu_custom_call.1
= control target key start
LH: loop header
LB: loop body
LE: loop exit
PB: predicated region body
PF: predicated region fallthrough
CT: control target
= control target key end

     0   :  { %12 = vsyncpa [#allocation3], 0  ;;  %s703_s0 = inlined_call_operand.vmem [shape: f32[8,42], index: 0, kind: input, shape index: {}]   ;;  %s704_s1 = inlined_call_operand.hbm [shape: bf16[42,128], index: 1, kind: input, shape index: {}]   ;;  %s705_s2 = inlined_call_operand.vmem [shape: f32[1,128], index: 2, kind: input, shape index: {}]   ;;  %s706_s3 = inlined_call_operand.vmem [shape: bf16[128,128], index: 3, kind: input, shape index: {}]   ;;  %s707_s4 = inlined_call_operand.hbm [shape: f32[1,128], index: 4, kind: input, shape index: {}]   ;;  %s708_s5 = inlined_call_operand.vmem [shape: bf16[128,10], index: 5, kind: input, shape index: {}]   ;;  %s709_s6 = inlined_call_operand.vmem [shape: f32[1,10], index: 6, kind: input, shape index: {}]   ;;  %s710_s7 = inlined_call_operand.hbm [shape: f32[8,10], index: 7, kind: output, shape index: {}]  }
   0x1   :  { %13 = vsyncpa [#allocation6], 0 }
   0x2   :  { %14 = vsyncpa [#allocation4], 0  ;;  %s565_s24 = smov [#allocation2]  }
   0x3   :  { %s22_s25 = sshll.u32 %s565_s24, 4  ;;  %s23_s25 = int_to_ptr.vmem [resolvable:$true] %s22_s25 }
   0x4   :  { %s507_s26 = scalar_lea.vmem %s23_s25, 384  ;;  %p512_p1 = scmp.lt.s32.totalorder %s23_s25, %s23_s25 }
   0x5   :  { %p508_p0 = scmp.ne.s32.totalorder %s23_s25, %s507_s26  ;;  %p513_p2 = scmp.lt.s32.totalorder %s507_s26, %s507_s26 }
   0x7   :  { %p514_p3 = por %p513_p2, %p512_p1 }
   0x9   :  { %p515_p4 = pnand %p514_p3, %p508_p0 }
   0xb   :  { %518 = shalt.err (!%p515_p4)
}
   0xc   :  { %s566_s27 = smov 64   ;;  %s567_s28 = smov 4  }
   0xd   :  { %28 = dma.hbm_to_vmem [thread:$0]  %s704_s1, 384, %s23_s25, [#allocation3], %s566_s27, %s566_s27, %s567_s28  }
   0xe   :  { %s568_s8 = smov [#allocation5]  }
   0xf   :  { %s39_s9 = sshll.u32 %s568_s8, 4  ;;  %s40_s9 = int_to_ptr.vmem [resolvable:$true] %s39_s9 }
  0x10   :  { %s527_s10 = scalar_lea.vmem %s40_s9, 16  ;;  %s531_s11 = scalar_lea.vmem %s40_s9, 32 }
  0x11   :  { %p528_p5 = scmp.ne.s32.totalorder %s40_s9, %s527_s10  ;;  %p532_p6 = scmp.lt.s32.totalorder %s40_s9, %s40_s9 }
  0x12   :  { %p533_p7 = scmp.lt.s32.totalorder %s531_s11, %s527_s10 }
  0x14   :  { %p534_p8 = por %p533_p7, %p532_p6 }
  0x16   :  { %p535_p9 = pnand %p534_p8, %p528_p5 }
  0x18   :  { %538 = shalt.err (!%p535_p9)
}
  0x19   :  { %42 = dma.hbm_to_vmem [thread:$0]  %s707_s4, 16, %s40_s9, [#allocation6]  }
  0x1a   :  { %559 = dma.done.wait [#allocation3], 384  }
  0x1b   :  { %560 = vsyncadd [#allocation3], 4294966912 }
  0x1c   :  { %561 = dma.done.wait [#allocation6], 16  }
  0x1d   :  { %562 = vsyncadd [#allocation6], 4294967280  ;;  %v569_v0 = vmov 0.0   ;;  %vm570_vm0 = vmmov 0   ;;  %vm90_vm1 = vcmask 1044480   ;;  %v481_v3 = vld [vmem:[#allocation2 + $0x8] sm:$0xff]  }
  0x1e   :  { %423 = vmatprep.subr.bf16.mxu0 %v569_v0  ;;  %429 = vmatprep.mubr.msk.bf16.mxu0 %vm570_vm0, %v569_v0  ;;  %v480_v1 = vld [vmem:[#allocation2 + $0x10] sm:$0x1f]   ;;  %v483_v4 = vld [vmem:[%s706_s3 + $0x38] sm:$0xff]   ;;  %v482_v5 = vld [vmem:[#allocation2] sm:$0xff]   ;;  %vm86_vm2 = vcmask 343040   ;;  %vm360_vm3 = vcmask 80896  }
  0x1f   :  { %433 = vmatprep.subr.bf16.mxu1 %v569_v0  ;;  %449 = vmatprep.mubr.msk.bf16.mxu1 %vm570_vm0, %v569_v0  ;;  %v92_v2 = vsel %vm90_vm1, %v480_v1, 0  ;;  %v484_v6 = vld [vmem:[%s706_s3 + $0x30] sm:$0xff]   ;;  %v54_v7 = vld [vmem:[%s703_s0] sm:$0xff]  ;;  %v485_v8 = vld [vmem:[%s706_s3 + $0x28] sm:$0xff]   ;;  %s571_s0 = smov [#allocation7]  }
  0x20   :  { %424 = vmatpush3.bf16.msra.mxu0 %v92_v2  ;;  %434 = vmatpush3.bf16.msra.mxu1 %v483_v4  ;;  %v55_v9 = vpack.c.bf16 %v54_v7, %v54_v7  ;;  %v486_v10 = vld [vmem:[%s706_s3 + $0x20] sm:$0xff]   ;;  %v487_v11 = vld [vmem:[%s706_s3 + $0x18] sm:$0xff]   ;;  %v488_v12 = vld [vmem:[%s706_s3 + $0x10] sm:$0xff]   ;;  %s368_s22 = sshll.u32 %s571_s0, 4  ;;  %s369_s22 = int_to_ptr.vmem [resolvable:$true] %s368_s22 }
  0x21   :  { %425 = vmatprep.subr.bf16.mxu0 %v569_v0  ;;  %435 = vmatprep.subr.bf16.mxu1 %v569_v0  ;;  %v489_v13 = vld [vmem:[%s706_s3 + $0x8] sm:$0xff]   ;;  %v490_v14 = vld [vmem:[%s706_s3] sm:$0xff]   ;;  %v491_v15 = vld [vmem:[%s708_s5 + $0x38] sm:$0xff]   ;;  %p544_p11 = scmp.lt.s32.totalorder %s369_s22, %s369_s22 }
  0x22   :  { %v492_v16 = vld [vmem:[%s708_s5 + $0x30] sm:$0xff]   ;;  %v493_v17 = vld [vmem:[%s708_s5 + $0x28] sm:$0xff]   ;;  %v494_v18 = vld [vmem:[%s708_s5 + $0x20] sm:$0xff]  }
  0x23   :  { %v495_v19 = vld [vmem:[%s708_s5 + $0x18] sm:$0xff]   ;;  %v496_v20 = vld [vmem:[%s708_s5 + $0x10] sm:$0xff]   ;;  %v378_v21 = vld [vmem:[%s705_s2] ss:$0 sm:$0xff] }
  0x24   :  { %426 = vmatpush3.bf16.msra.mxu0 %v481_v3  ;;  %436 = vmatpush3.bf16.msra.mxu1 %v484_v6  ;;  %v497_v29 = vld [vmem:[%s708_s5 + $0x8] sm:$0xff]   ;;  %v498_v30 = vld [vmem:[%s708_s5] sm:$0xff]   ;;  %v383_v31 = vld [vmem:[#allocation5] ss:$0 sm:$0xff]  ;;  %s539_s5 = scalar_lea.vmem %s369_s22, 128 }
  0x25   :  { %427 = vmatprep.subr.bf16.mxu0 %v569_v0  ;;  %437 = vmatprep.subr.bf16.mxu1 %v569_v0  ;;  %v392_v39 = vld [vmem:[%s709_s6] ss:$0 sm:$0xff]  ;;  %p540_p10 = scmp.ne.s32.totalorder %s369_s22, %s539_s5  ;;  %p545_p12 = scmp.lt.s32.totalorder %s539_s5, %s539_s5 }
  0x27   :  { %p546_p13 = por %p545_p12, %p544_p11 }
  0x28   :  { %428 = vmatpush3.bf16.msra.mxu0 %v482_v5  ;;  %438 = vmatpush3.bf16.msra.mxu1 %v485_v8 }
  0x29   :  { %453 = vmatprep.subr.bf16.mxu0 %v569_v0  ;;  %439 = vmatprep.subr.bf16.mxu1 %v569_v0  ;;  %p547_p0 = pnand %p546_p13, %p540_p10 }
  0x2b   :  { %430 = vmatmul.mubr.msk.bf16.vlgmr.msra.gmra.mxu0 %vm86_vm2, %v55_v9 }
  0x2c   :  { %469 = vmatprep.mubr.msk.bf16.mxu0 %vm570_vm0, %v569_v0  ;;  %440 = vmatpush3.bf16.msra.mxu1 %v486_v10 }
  0x2d   :  { %441 = vmatprep.subr.bf16.mxu1 %v569_v0  ;;  %454 = vmatpush3.bf16.msra.mxu0 %v491_v15 }
  0x2e   :  { %455 = vmatprep.subr.bf16.mxu0 %v569_v0 }
  0x30   :  { %442 = vmatpush3.bf16.msra.mxu1 %v487_v11 }
  0x31   :  { %443 = vmatprep.subr.bf16.mxu1 %v569_v0  ;;  %456 = vmatpush3.bf16.msra.mxu0 %v492_v16 }
  0x32   :  { %457 = vmatprep.subr.bf16.mxu0 %v569_v0 }
  0x34   :  { %444 = vmatpush3.bf16.msra.mxu1 %v488_v12 }
  0x35   :  { %445 = vmatprep.subr.bf16.mxu1 %v569_v0  ;;  %458 = vmatpush3.bf16.msra.mxu0 %v493_v17 }
  0x36   :  { %459 = vmatprep.subr.bf16.mxu0 %v569_v0 }
  0x38   :  { %446 = vmatpush3.bf16.msra.mxu1 %v489_v13 }
  0x39   :  { %447 = vmatprep.subr.bf16.mxu1 %v569_v0  ;;  %460 = vmatpush3.bf16.msra.mxu0 %v494_v18 }
  0x3a   :  { %461 = vmatprep.subr.bf16.mxu0 %v569_v0 }
  0x3c   :  { %448 = vmatpush3.bf16.msra.mxu1 %v490_v14 }
  0x3d   :  { %462 = vmatpush3.bf16.msra.mxu0 %v495_v19 }
  0x3e   :  { %463 = vmatprep.subr.bf16.mxu0 %v569_v0 }
  0x41   :  { %464 = vmatpush3.bf16.msra.mxu0 %v496_v20 }
  0x42   :  { %465 = vmatprep.subr.bf16.mxu0 %v569_v0 }
  0x45   :  { %466 = vmatpush3.bf16.msra.mxu0 %v497_v29 }
  0x46   :  { %467 = vmatprep.subr.bf16.mxu0 %v569_v0 }
  0x49   :  { %468 = vmatpush3.bf16.msra.mxu0 %v498_v30 }
  0xeb   :  { %v128_v22 = vpop.f32.mrf.mxu0 }
  0xec   :  { %v129_v23 = vadd.f32 %v378_v21, %v128_v22 }
  0xed   :  { %v431_v24 = vpop.f32.mrf.mxu0 }
  0xee   :  { %v134_v25 = vmax.f32 %v129_v23, 0.0 }
  0xef   :  { %v131_v26 = vpop.f32.mrf.mxu0 }
  0xf0   :  { %v135_v27 = vpack.c.bf16 %v134_v25, %v134_v25 }
  0xf1   :  { %v432_v28 = vpop.f32.mrf.mxu0 }
  0xf2   :  { %450 = vmatmul.mubr.bf16.vlgmr.msra.gmra.mxu1 %v135_v27 }
 0x1b2   :  { %v241_v32 = vpop.f32.mrf.mxu1 }
 0x1b3   :  { %v242_v33 = vadd.f32 %v383_v31, %v241_v32 }
 0x1b4   :  { %v451_v34 = vpop.f32.mrf.mxu1 }
 0x1b5   :  { %v247_v35 = vmax.f32 %v242_v33, 0.0 }
 0x1b6   :  { %v244_v36 = vpop.f32.mrf.mxu1 }
 0x1b7   :  { %v248_v37 = vpack.c.bf16 %v247_v35, %v247_v35 }
 0x1b8   :  { %v452_v38 = vpop.f32.mrf.mxu1 }
 0x1b9   :  { %470 = vmatmul.mubr.bf16.vlgmr.msra.gmra.mxu0 %v248_v37 }
 0x279   :  { %v354_v40 = vpop.f32.mrf.mxu0 }
 0x27a   :  { %v355_v41 = vadd.f32 %v392_v39, %v354_v40 }
 0x27b   :  { %v471_v42 = vpop.f32.mrf.mxu0 }
 0x27c   :  { %361 = vst.msk [vmem:[#allocation7] sm:$0xff] %vm360_vm3, %v355_v41 }
 0x27d   :  { %v357_v43 = vpop.f32.mrf.mxu0 }
 0x27e   :  { %550 = shalt.err (!%p547_p0)
}
 0x27f   :  { %371 = dma.vmem_to_hbm [thread:$0]  %s369_s22, 128, %s710_s7, [#allocation4]   ;;  %v472_v44 = vpop.f32.mrf.mxu0 }
 0x280   :  { %563 = dma.done.wait [#allocation4], 128  }
 0x281   :  { %564 = vsyncadd [#allocation4], 4294967168 }
 0x282   :  { %375 = vsyncpa [#allocation3], 1 }
 0x283   :  { %376 = vsyncpa [#allocation6], 1 }
 0x284   :  { %377 = vsyncpa [#allocation4], 1 }

</bundles_post_ra>
